<compile_context>
chip_gen: v7x
topology: tpu7x:2x2x1
jax: 0.10.0
libtpu: 0.0.40
codegen_flags: <defaults>
</compile_context>

<pallas_src>
import jax
import jax.numpy as jnp
from jax.experimental import pallas as pl
from jax.experimental.pallas import tpu as pltpu


def _cdiv(a, b):
    return -(-a // b)


def _make_sse_kernel(td, kk, tail, row_sub=64):
    """Build the lane-partial SSE kernel.

    td   : feature tile width (multiple of 128)
    kk   : number of feature (reduction) grid steps
    tail : number of valid feature columns inside the LAST feature tile (1..td)
    """
    nchunks_full = td // 128
    nchunks_last = _cdiv(tail, 128)
    rem = tail - (nchunks_last - 1) * 128          # valid lanes in boundary chunk
    boundary_partial = rem != 128
    uniform = (nchunks_last == nchunks_full) and not boundary_partial

    def _accum_tile(pred_ref, targ_ref, out_ref, *, is_last, zero_init):
        tn = out_ref.shape[0]
        nchunks = nchunks_last if is_last else nchunks_full
        r = 0
        while r < tn:                              # static row sub-blocks (vreg-sized)
            rs = min(row_sub, tn - r)
            if zero_init:
                acc = jnp.zeros((rs, 128), jnp.float32)
            else:
                acc = out_ref[r:r + rs, :]         # read accumulator once
            for c in range(nchunks):               # static, aligned 128-lane chunks
                p = pred_ref[r:r + rs, c * 128:(c + 1) * 128].astype(jnp.float32)
                t = targ_ref[r:r + rs, c * 128:(c + 1) * 128].astype(jnp.float32)
                d = p - t
                if is_last and boundary_partial and c == nchunks - 1:
                    # mask lanes past the true feature dimension D before accumulating
                    lane = jax.lax.broadcasted_iota(jnp.int32, (rs, 128), 1)
                    d = jnp.where(lane < rem, d, jnp.float32(0.0))
                acc = acc + d * d                  # register accumulation (VPU only)
            out_ref[r:r + rs, :] = acc             # write accumulator once
            r += rs

    def kernel(pred_ref, targ_ref, out_ref):
        if kk == 1:
            _accum_tile(pred_ref, targ_ref, out_ref, is_last=True, zero_init=True)
            return

        k = pl.program_id(1)

        @pl.when(k == 0)
        def _():
            _accum_tile(pred_ref, targ_ref, out_ref, is_last=False, zero_init=True)

        if uniform:
            @pl.when(k > 0)
            def _():
                _accum_tile(pred_ref, targ_ref, out_ref, is_last=False, zero_init=False)
        else:
            @pl.when(jnp.logical_and(k > 0, k < kk - 1))
            def _():
                _accum_tile(pred_ref, targ_ref, out_ref, is_last=False, zero_init=False)

            @pl.when(k == kk - 1)
            def _():
                _accum_tile(pred_ref, targ_ref, out_ref, is_last=True, zero_init=False)

    return kernel


def temporal_weighted_loss(pred, target, aux_logits, main_weight=0.8,
                           *, td_max=4096, tn_max=256):
    """Matches TemporalWeightedLoss.forward:
        loss_bt  = mean over (C,H,W) of (pred - target)^2
        weights  = cat(softmax(aux_logits) * (1 - main_weight), [main_weight])
        return mean over (B,T) of loss_bt * weights_t
    """
    B, T, C, H, W = pred.shape
    assert aux_logits.shape[0] == T - 1
    N = B * T
    D = C * H * W

    pred2 = pred.reshape(N, D)       # contiguous reshape — no data movement
    targ2 = target.reshape(N, D)

    # ---- tile selection --------------------------------------------------
    sub = 16 if pred.dtype == jnp.bfloat16 else 8
    nsub = _cdiv(N, sub)
    # >= 2 row grid steps whenever possible so both v7x TensorCores get work.
    ii = max(_cdiv(nsub, max(tn_max // sub, 1)), min(2, nsub))
    tn = sub * _cdiv(nsub, ii)
    ii = _cdiv(N, tn)
    n_out = ii * tn                  # output rows (>= N); extra rows never read

    nlane = _cdiv(D, 128)
    m = max(td_max // 128, 1)
    kk = _cdiv(nlane, m)
    td = 128 * _cdiv(nlane, kk)
    tail = D - (kk - 1) * td         # valid feature columns in the last tile (1..td)

    kernel = _make_sse_kernel(td, kk, tail)

    out = pl.pallas_call(
        kernel,
        out_shape=jax.ShapeDtypeStruct((n_out, 128), jnp.float32),
        grid_spec=pltpu.PrefetchScalarGridSpec(
            num_scalar_prefetch=0,
            grid=(ii, kk),           # rows (parallel), features (reduction, last)
            in_specs=[
                pl.BlockSpec((tn, td), lambda i, k: (i, k)),
                pl.BlockSpec((tn, td), lambda i, k: (i, k)),
            ],
            out_specs=pl.BlockSpec((tn, 128), lambda i, k: (i, 0)),
        ),
        compiler_params=pltpu.CompilerParams(
            dimension_semantics=("parallel", "arbitrary"),
            vmem_limit_bytes=48 * 1024 * 1024,
        ),
    )(pred2, targ2)

    # ---- tiny JAX epilogue (O(N) work) ------------------------------------
    aux_w = jax.nn.softmax(aux_logits.astype(jnp.float32)) * (1.0 - main_weight)
    weights_t = jnp.concatenate(
        [aux_w, jnp.array([main_weight], dtype=jnp.float32)], axis=0)   # (T,)
    row_sse = jnp.sum(out[:N], axis=-1)                                 # (N,)
    w_rows = jnp.tile(weights_t, B)                                     # (N,) b-major
    return jnp.sum(row_sse * w_rows) / (float(D) * float(N))


def _reference(pred, target, aux_logits, main_weight=0.8):
    loss = jnp.mean((pred.astype(jnp.float32) - target.astype(jnp.float32)) ** 2,
                    axis=(2, 3, 4))
    aux_w = jax.nn.softmax(aux_logits.astype(jnp.float32)) * (1.0 - main_weight)
    weights = jnp.concatenate([aux_w, jnp.array([main_weight], jnp.float32)])
    return jnp.mean(loss * weights[None, :])


if __name__ == "__main__":
    # small shapes: B=2, T=8, C=4, H=16, W=16
    B, T, C, H, W = 2, 8, 4, 16, 16
    key = jax.random.PRNGKey(0)
    k1, k2 = jax.random.split(key)
    pred = jax.random.normal(k1, (B, T, C, H, W), dtype=jnp.float32)
    target = jax.random.normal(k2, (B, T, C, H, W), dtype=jnp.float32)

    # parameter init mirrors nn.Parameter(torch.zeros(seq_len - 1))
    aux_logits = jnp.zeros((T - 1,), dtype=jnp.float32)

    out = temporal_weighted_loss(pred, target, aux_logits, main_weight=0.8)
    out = jax.block_until_ready(out)

    ref = _reference(pred, target, aux_logits, main_weight=0.8)
    assert jnp.allclose(out, ref, rtol=1e-5, atol=1e-6), (out, ref)

    print("KERNEL_OK")
</pallas_src>

<mosaic_0001>
module attributes {stable_mosaic.version = 11 : i64} {
  func.func @kernel(%arg0: i32, %arg1: i32, %arg2: memref<8x1024xf32, #tpu.memory_space<vmem>>, %arg3: memref<8x1024xf32, #tpu.memory_space<vmem>>, %arg4: memref<8x128xf32, #tpu.memory_space<vmem>>) attributes {dimension_semantics = [#tpu.dimension_semantics<parallel>, #tpu.dimension_semantics<arbitrary>], iteration_bounds = array<i64: 2, 1>, scalar_prefetch = 0 : i64, scratch_operands = 0 : i64, tpu.core_type = #tpu.core_type<tc>, window_params = [{transform_indices = @transform_0, window_bounds = array<i64: 8, 1024>}, {transform_indices = @transform_1, window_bounds = array<i64: 8, 1024>}, {transform_indices = @transform_2, window_bounds = array<i64: 8, 128>}]} {
    %cst = arith.constant 0.000000e+00 : f32
    %0 = vector.broadcast %cst : f32 to vector<8x128xf32>
    %c0 = arith.constant 0 : index
    %c0_0 = arith.constant 0 : index
    %1 = vector.load %arg2[%c0, %c0_0] : memref<8x1024xf32, #tpu.memory_space<vmem>>, vector<8x128xf32>
    %c0_1 = arith.constant 0 : index
    %c0_2 = arith.constant 0 : index
    %2 = vector.load %arg3[%c0_1, %c0_2] : memref<8x1024xf32, #tpu.memory_space<vmem>>, vector<8x128xf32>
    %3 = arith.subf %1, %2 : vector<8x128xf32>
    %4 = arith.mulf %3, %3 : vector<8x128xf32>
    %5 = arith.addf %0, %4 : vector<8x128xf32>
    %c0_3 = arith.constant 0 : index
    %c128 = arith.constant 128 : index
    %6 = vector.load %arg2[%c0_3, %c128] : memref<8x1024xf32, #tpu.memory_space<vmem>>, vector<8x128xf32>
    %c0_4 = arith.constant 0 : index
    %c128_5 = arith.constant 128 : index
    %7 = vector.load %arg3[%c0_4, %c128_5] : memref<8x1024xf32, #tpu.memory_space<vmem>>, vector<8x128xf32>
    %8 = arith.subf %6, %7 : vector<8x128xf32>
    %9 = arith.mulf %8, %8 : vector<8x128xf32>
    %10 = arith.addf %5, %9 : vector<8x128xf32>
    %c0_6 = arith.constant 0 : index
    %c256 = arith.constant 256 : index
    %11 = vector.load %arg2[%c0_6, %c256] : memref<8x1024xf32, #tpu.memory_space<vmem>>, vector<8x128xf32>
    %c0_7 = arith.constant 0 : index
    %c256_8 = arith.constant 256 : index
    %12 = vector.load %arg3[%c0_7, %c256_8] : memref<8x1024xf32, #tpu.memory_space<vmem>>, vector<8x128xf32>
    %13 = arith.subf %11, %12 : vector<8x128xf32>
    %14 = arith.mulf %13, %13 : vector<8x128xf32>
    %15 = arith.addf %10, %14 : vector<8x128xf32>
    %c0_9 = arith.constant 0 : index
    %c384 = arith.constant 384 : index
    %16 = vector.load %arg2[%c0_9, %c384] : memref<8x1024xf32, #tpu.memory_space<vmem>>, vector<8x128xf32>
    %c0_10 = arith.constant 0 : index
    %c384_11 = arith.constant 384 : index
    %17 = vector.load %arg3[%c0_10, %c384_11] : memref<8x1024xf32, #tpu.memory_space<vmem>>, vector<8x128xf32>
    %18 = arith.subf %16, %17 : vector<8x128xf32>
    %19 = arith.mulf %18, %18 : vector<8x128xf32>
    %20 = arith.addf %15, %19 : vector<8x128xf32>
    %c0_12 = arith.constant 0 : index
    %c512 = arith.constant 512 : index
    %21 = vector.load %arg2[%c0_12, %c512] : memref<8x1024xf32, #tpu.memory_space<vmem>>, vector<8x128xf32>
    %c0_13 = arith.constant 0 : index
    %c512_14 = arith.constant 512 : index
    %22 = vector.load %arg3[%c0_13, %c512_14] : memref<8x1024xf32, #tpu.memory_space<vmem>>, vector<8x128xf32>
    %23 = arith.subf %21, %22 : vector<8x128xf32>
    %24 = arith.mulf %23, %23 : vector<8x128xf32>
    %25 = arith.addf %20, %24 : vector<8x128xf32>
    %c0_15 = arith.constant 0 : index
    %c640 = arith.constant 640 : index
    %26 = vector.load %arg2[%c0_15, %c640] : memref<8x1024xf32, #tpu.memory_space<vmem>>, vector<8x128xf32>
    %c0_16 = arith.constant 0 : index
    %c640_17 = arith.constant 640 : index
    %27 = vector.load %arg3[%c0_16, %c640_17] : memref<8x1024xf32, #tpu.memory_space<vmem>>, vector<8x128xf32>
    %28 = arith.subf %26, %27 : vector<8x128xf32>
    %29 = arith.mulf %28, %28 : vector<8x128xf32>
    %30 = arith.addf %25, %29 : vector<8x128xf32>
    %c0_18 = arith.constant 0 : index
    %c768 = arith.constant 768 : index
    %31 = vector.load %arg2[%c0_18, %c768] : memref<8x1024xf32, #tpu.memory_space<vmem>>, vector<8x128xf32>
    %c0_19 = arith.constant 0 : index
    %c768_20 = arith.constant 768 : index
    %32 = vector.load %arg3[%c0_19, %c768_20] : memref<8x1024xf32, #tpu.memory_space<vmem>>, vector<8x128xf32>
    %33 = arith.subf %31, %32 : vector<8x128xf32>
    %34 = arith.mulf %33, %33 : vector<8x128xf32>
    %35 = arith.addf %30, %34 : vector<8x128xf32>
    %c0_21 = arith.constant 0 : index
    %c896 = arith.constant 896 : index
    %36 = vector.load %arg2[%c0_21, %c896] : memref<8x1024xf32, #tpu.memory_space<vmem>>, vector<8x128xf32>
    %c0_22 = arith.constant 0 : index
    %c896_23 = arith.constant 896 : index
    %37 = vector.load %arg3[%c0_22, %c896_23] : memref<8x1024xf32, #tpu.memory_space<vmem>>, vector<8x128xf32>
    %38 = arith.subf %36, %37 : vector<8x128xf32>
    %39 = arith.mulf %38, %38 : vector<8x128xf32>
    %40 = arith.addf %35, %39 : vector<8x128xf32>
    %c0_24 = arith.constant 0 : index
    %c0_25 = arith.constant 0 : index
    %41 = vector.load %arg4[%c0_24, %c0_25] : memref<8x128xf32, #tpu.memory_space<vmem>>, vector<8x128xf32>
    tpu.vector_store %arg4[%c0_24, %c0_25], %40 {strides = array<i32>} : memref<8x128xf32, #tpu.memory_space<vmem>>, vector<8x128xf32>,
    return
  }
  func.func @transform_0(%arg0: i32, %arg1: i32) -> (i32, i32) {
    %c0_i32 = arith.constant 0 : i32
    return %arg0, %arg1 : i32, i32
  }
  func.func @transform_1(%arg0: i32, %arg1: i32) -> (i32, i32) {
    %c0_i32 = arith.constant 0 : i32
    return %arg0, %arg1 : i32, i32
  }
  func.func @transform_2(%arg0: i32, %arg1: i32) -> (i32, i32) {
    %c0_i32 = arith.constant 0 : i32
    %c0_i32_0 = arith.constant 0 : i32
    return %arg0, %c0_i32 : i32, i32
  }
}

</mosaic_0001>

<bundles_post_ra>
// kernel: tpu_custom_call.1
= control target key start
LH: loop header
LB: loop body
LE: loop exit
PB: predicated region body
PF: predicated region fallthrough
CT: control target
= control target key end

     0   :  { %7 = vsyncpa [#allocation3], 0  ;;  %s863_s0 = inlined_call_operand.hbm [shape: f32[16,1024], index: 0, kind: input, shape index: {}]   ;;  %s864_s1 = inlined_call_operand.hbm [shape: f32[16,1024], index: 1, kind: input, shape index: {}]   ;;  %s865_s2 = inlined_call_operand.hbm [shape: f32[16,128], index: 2, kind: output, shape index: {}]  }
   0x1   :  { %9 = vsyncpa [#allocation3 + $0x1], 0 }
   0x2   :  { %10 = vsyncpa [#allocation6], 0 }
   0x3   :  { %12 = vsyncpa [#allocation6 + $0x1], 0 }
   0x4   :  { %13 = vsyncpa [#allocation4], 0 }
   0x5   :  { %15 = vsyncpa [#allocation4 + $0x1], 0  ;;  %s632_s9 = smov 0   ;;  %s634_s10 = smov 0  }
   0x6   :  { %s636_s11 = smov 0   ;;  %s638_s12 = smov 0  }
   0x7   :  { %s640_s13 = smov 0   ;;  %s642_s14 = smov 0  }
   0x8 LB: > { %s379_s15 = sadd.s32 4294967295, %s612_s14   ;;  %s380_s16 = sadd.s32 4294967294, %s612_s14   ;;  %s612_s14 = sphi %s642_s14, %s21_s14   ;;  %s608_s13 = sphi %s640_s13, %s885_s13   ;;  %s604_s12 = sphi %s638_s12, %s884_s12   ;;  %s600_s11 = sphi %s636_s11, %s883_s11   ;;  %s596_s10 = sphi %s634_s10, %s882_s10   ;;  %s592_s9 = sphi %s632_s9, %s881_s9  }
   0x9   : > { %s33_s17 = sadd.s32 1, %s608_s13  ;;  %s42_s18 = sadd.s32 1, %s600_s11 }
   0xa   : > { %p35_p0 = scmp.ge.s32.totalorder %s33_s17, 2  ;;  %p49_p1 = scmp.ne.s32.totalorder %s600_s11, %s596_s10 }
   0xb   : > { %p50_p2 = scmp.eq.s32.totalorder %s612_s14, 0  ;;  %p55_p3 = scmp.ne.s32.totalorder %s596_s10, %s592_s9 }
   0xc   : > { %s887_s17 = smov (%p35_p0, %s33_s17), 0  ;;  %p56_p5 = scmp.eq.s32.totalorder %s379_s15, 0 }
   0xd   : > { %p673_p4 = por %p50_p2, %p49_p1  ;;  %s37_s20 = ssub.s32 %s608_s13, %s887_s17 }
   0xe   : > { %p107_p6 = scmp.eq.s32.totalorder %s379_s15, 1  ;;  %p40_p7 = scmp.eq.s32.totalorder %s37_s20, 0 }
   0xf   : > { %p679_p8 = por %p56_p5, %p55_p3  ;;  %p113_p10 = scmp.eq.s32.totalorder %s380_s16, 1 }
  0x10   : > { %p683_p9 = por %p107_p6, %p49_p1  ;;  %p416_p13 = scmp.lt.s32.totalorder %s612_s14, 2 }
  0x11   : > { %s869_s21 = scalar_select %p679_p8, 1, 0 }
  0x12   : > { %s870_s22 = scalar_select %p683_p9, 1, 0 }
  0x13   : > { %s688_s23 = scalar_select %p40_p7, %s600_s11, %s42_s18  }
  0x14   : > { %p690_p11 = por %p113_p10, %p55_p3  ;;  %s697_s25 = sand.u32 1, %s600_s11  }
  0x15   : > { %s383_s26 = sshll.u32 %s697_s25, 6  ;;  %s397_s27 = sshll.u32 %s608_s13, 10 }
  0x16   : > { %s871_s24 = scalar_select %p690_p11, 1, 0 }
  0x17   : > { %s706_s30 = scalar_lea.hbm %s863_s0, %s397_s27  ;;  %s137_s3 = scalar_lea.vmem [#allocation2], %s383_s26 }
  0x18   : > { %s147_s4 = sshll.u32 %s137_s3, 4  ;;  %p714_p0 = pnand %p416_p13, %p673_p4  ;;  %s710_s4 = int_to_ptr.vmem [resolvable:$true] %s147_s4 }
  0x19   : > { %s134_s6 = scalar_lea.sflag [#allocation3], %s697_s25  ;;  %s466_s7 = scalar_lea.hbm %s706_s30, 1024 }
  0x1a   : > { %p467_p3 = scmp.ne.s32.totalorder %s706_s30, %s466_s7  ;;  %p468_p5 = pneg %p714_p0 }
  0x1b   : > { %s471_s16 = scalar_lea.hbm %s863_s0, 2048  ;;  %p472_p4 = scmp.lt.u32.totalorder %s706_s30, %s863_s0 }
  0x1c   : > { %p469_p6 = pnand %p468_p5, %p467_p3  ;;  %p473_p10 = scmp.lt.u32.totalorder %s471_s16, %s466_s7 }
  0x1d   : > { %p475_p12 = scmp.lt.u32.totalorder %s466_s7, %s706_s30 }
  0x1e   : > { %p470_p7 = pneg %p469_p6  ;;  %p474_p13 = por %p473_p10, %p472_p4 }
  0x20   : > { %p476_p1 = por %p475_p12, %p474_p13 }
  0x22   : > { %p477_p2 = pnand %p476_p1, %p470_p7 }
  0x24   : > { %480 = shalt.err (!%p477_p2)
}
  0x25   : > { %s481_s20 = scalar_lea.vmem %s710_s4, 1024  ;;  %s614_s28 = smov [#allocation2]  }
  0x26   : > { %p482_p3 = scmp.ne.s32.totalorder %s710_s4, %s481_s20  ;;  %s486_s29 = sshll.u32 %s614_s28, 4  ;;  %s487_s29 = int_to_ptr.vmem [resolvable:$false] %s486_s29 }
  0x27   : > { %s488_s3 = scalar_lea.vmem %s487_s29, 2048  ;;  %p489_p9 = scmp.lt.s32.totalorder %s710_s4, %s487_s29 }
  0x28   : > { %p484_p6 = pnand %p482_p3, %p468_p5  ;;  %p490_p4 = scmp.lt.s32.totalorder %s488_s3, %s481_s20 }
  0x2a   : > { %p485_p11 = pneg %p484_p6  ;;  %p491_p10 = por %p490_p4, %p489_p9 }
  0x2c   : > { %p492_p12 = pnand %p491_p10, %p485_p11 }
  0x2e   : > { %495 = shalt.err (!%p492_p12)
}
  0x2f   : > { %408 = dma.hbm_to_vmem [thread:$0]  (!%p714_p0), %s706_s30, 1024, %s710_s4, %s134_s6  }
  0x30   : > { %p873_p1 = scmp.lt.s32.totalorder %s612_s14, 3  ;;  %p874_p2 = scmp.ge.s32.totalorder %s612_s14, 1 }
  0x31   : > { %s759_s16 = scalar_lea.hbm %s864_s1, %s397_s27  ;;  %s158_s18 = scalar_lea.vmem [#allocation5], %s383_s26 }
  0x32   : > { %p750_p7 = pnand %p874_p2, %p873_p1  ;;  %s168_s19 = sshll.u32 %s158_s18, 4  ;;  %s169_s19 = int_to_ptr.vmem [resolvable:$true] %s168_s19 }
  0x33   : > { %s155_s30 = scalar_lea.sflag [#allocation6], %s697_s25  ;;  %s496_s4 = scalar_lea.hbm %s759_s16, 1024 }
  0x34   : > { %s875_s7 = scalar_select %p750_p7, 1, 0 }
  0x35   : > { %p497_p9 = scmp.ne.s32.totalorder %s759_s16, %s496_s4  ;;  %s501_s27 = scalar_lea.hbm %s864_s1, 2048 }
  0x36   : > { %p502_p3 = scmp.lt.u32.totalorder %s759_s16, %s864_s1  ;;  %p503_p6 = scmp.lt.u32.totalorder %s501_s27, %s496_s4 }
  0x37   : > { %p499_p11 = pnand %p497_p9, %p468_p5  ;;  %p505_p10 = scmp.lt.u32.totalorder %s496_s4, %s759_s16 }
  0x38   : > { %p504_p4 = por %p503_p6, %p502_p3 }
  0x39   : > { %p500_p13 = pneg %p499_p11 }
  0x3a   : > { %p506_p12 = por %p505_p10, %p504_p4 }
  0x3c   : > { %p507_p1 = pnand %p506_p12, %p500_p13 }
  0x3e   : > { %510 = shalt.err (!%p507_p1)
}
  0x3f   : > { %s511_s25 = scalar_lea.vmem %s169_s19, 1024  ;;  %s615_s26 = smov [#allocation5]  }
  0x40   : > { %p512_p2 = scmp.ne.s32.totalorder %s169_s19, %s511_s25  ;;  %s516_s3 = sshll.u32 %s615_s26, 4  ;;  %s517_s3 = int_to_ptr.vmem [resolvable:$false] %s516_s3 }
  0x41   : > { %s518_s8 = scalar_lea.vmem %s517_s3, 2048  ;;  %p519_p8 = scmp.lt.s32.totalorder %s169_s19, %s517_s3 }
  0x42   : > { %p514_p9 = pnand %p512_p2, %p468_p5  ;;  %p520_p7 = scmp.lt.s32.totalorder %s518_s8, %s511_s25 }
  0x44   : > { %p515_p11 = pneg %p514_p9  ;;  %p521_p3 = por %p520_p7, %p519_p8 }
  0x46   : > { %p522_p6 = pnand %p521_p3, %p515_p11 }
  0x48   : > { %525 = shalt.err (!%p522_p6)
}
  0x49   : > { %411 = dma.hbm_to_vmem [thread:$0]  (!%p714_p0), %s759_s16, 1024, %s169_s19, %s155_s30  }
  0x4a   : > { %p876_p13 = scmp.ne.s32.totalorder %s875_s7, 0 }
  0x4b   : > { %s786_s15 = sand.u32 (!%p876_p13), 1, %s596_s10   ;;  %p877_p8 = scmp.ne.s32.totalorder (!%p876_p13), %s869_s21, 0 }
  0x4c   : > { %177 = sbr.rel (%p876_p13) target bundleno = 120 (0x78), region = 28  ;;  %s390_s18 = sshll.u32 (!%p876_p13), %s786_s15, 6 }
  0x4d   : > { %s180_s4 = scalar_lea.sflag (!%p876_p13), [#allocation3], %s786_s15  ;;  %s790_s6 = scalar_lea.vmem (!%p876_p13), [#allocation2], %s390_s18 }
  0x53   : > { %579 = dma.done.wait (%p877_p8), %s180_s4, 1024  }
  0x54   : > { %581 = vsyncadd (%p877_p8), %s180_s4, 4294966272  ;;  %s189_s5 = scalar_lea.sflag [#allocation6], %s786_s15  ;;  %s192_s7 = scalar_lea.vmem [#allocation5], %s390_s18 }
  0x55   : > { %583 = dma.done.wait (%p877_p8), %s189_s5, 1024  }
  0x56   : > { %585 = vsyncadd (%p877_p8), %s189_s5, 4294966272  ;;  %v220_v0 = vld [vmem:[%s790_s6] sm:$0xff]  ;;  %v225_v2 = vld [vmem:[%s790_s6 + $0x8] sm:$0xff]  ;;  %s392_s21 = sshll.u32 %s786_s15, 3  ;;  %s394_s30 = sshll.u32 %s604_s12, 7 }
  0x57   : > { %v221_v1 = vld [vmem:[%s192_s7] sm:$0xff]  ;;  %v226_v4 = vld [vmem:[%s192_s7 + $0x8] sm:$0xff]  ;;  %v230_v5 = vld [vmem:[%s790_s6 + $0x10] sm:$0xff]  ;;  %s217_s16 = scalar_lea.vmem [#allocation7], %s392_s21  ;;  %s816_s28 = scalar_lea.hbm %s865_s2, %s394_s30 }
  0x58   : > { %v222_v3 = vsub.f32 %v220_v0, %v221_v1  ;;  %v231_v6 = vld [vmem:[%s192_s7 + $0x10] sm:$0xff]  ;;  %v227_v7 = vsub.f32 %v225_v2, %v226_v4  ;;  %v235_v9 = vld [vmem:[%s790_s6 + $0x18] sm:$0xff]  ;;  %v240_v11 = vld [vmem:[%s790_s6 + $0x20] sm:$0xff]  ;;  %s275_s19 = sshll.u32 %s217_s16, 4  ;;  %s262_s29 = scalar_lea.sflag [#allocation4], %s786_s15  ;;  %s811_s19 = int_to_ptr.vmem [resolvable:$true] %s275_s19 }
  0x59   : > { %v232_v8 = vsub.f32 %v230_v5, %v231_v6  ;;  %v236_v10 = vld [vmem:[%s192_s7 + $0x18] sm:$0xff]  ;;  %v241_v14 = vld [vmem:[%s192_s7 + $0x20] sm:$0xff]  ;;  %v245_v15 = vld [vmem:[%s790_s6 + $0x28] sm:$0xff]  ;;  %s526_s25 = scalar_lea.vmem %s811_s19, 128  ;;  %p878_p5 = scmp.ne.s32.totalorder %s870_s22, 0 }
  0x5a   : > { %v223_v12 = vmul.f32 %v222_v3, %v222_v3  ;;  %v237_v13 = vsub.f32 %v235_v9, %v236_v10  ;;  %v246_v16 = vld [vmem:[%s192_s7 + $0x28] sm:$0xff]  ;;  %v228_v17 = vmul.f32 %v227_v7, %v227_v7  ;;  %v242_v19 = vsub.f32 %v240_v11, %v241_v14  ;;  %v250_v20 = vld [vmem:[%s790_s6 + $0x30] sm:$0xff]  ;;  %v255_v25 = vld [vmem:[%s790_s6 + $0x38] sm:$0xff]  ;;  %p527_p0 = scmp.ne.s32.totalorder %s811_s19, %s526_s25  ;;  %s616_s12 = smov [#allocation7]  }
  0x5b   : > { %v233_v18 = vmul.f32 %v232_v8, %v232_v8  ;;  %v251_v21 = vld [vmem:[%s192_s7 + $0x30] sm:$0xff]  ;;  %v247_v24 = vsub.f32 %v245_v15, %v246_v16  ;;  %v256_v26 = vld [vmem:[%s192_s7 + $0x38] sm:$0xff]  ;;  %s530_s26 = sshll.u32 %s616_s12, 4  ;;  %s531_s26 = int_to_ptr.vmem [resolvable:$false] %s530_s26 }
  0x5c   : > { %v229_v22 = vadd.f32 %v228_v17, %v223_v12  ;;  %v238_v23 = vmul.f32 %v237_v13, %v237_v13  ;;  %v243_v28 = vmul.f32 %v242_v19, %v242_v19  ;;  %v252_v29 = vsub.f32 %v250_v20, %v251_v21  ;;  %p528_p7 = pnand %p527_p0, %p878_p5  ;;  %s532_s3 = scalar_lea.vmem %s531_s26, 256 }
  0x5d   : > { %v248_v31 = vmul.f32 %v247_v24, %v247_v24  ;;  %v257_v32 = vsub.f32 %v255_v25, %v256_v26  ;;  %p533_p10 = scmp.lt.s32.totalorder %s811_s19, %s531_s26  ;;  %p534_p12 = scmp.lt.s32.totalorder %s532_s3, %s526_s25 }
  0x5e   : > { %v234_v27 = vadd.f32 %v233_v18, %v229_v22  ;;  %v253_v34 = vmul.f32 %v252_v29, %v252_v29  ;;  %p529_p4 = pneg %p528_p7 }
  0x5f   : > { %v258_v36 = vmul.f32 %v257_v32, %v257_v32  ;;  %p535_p1 = por %p534_p12, %p533_p10 }
  0x60   : > { %v239_v30 = vadd.f32 %v238_v23, %v234_v27 }
  0x61   : > { %p536_p2 = pnand %p535_p1, %p529_p4 }
  0x62   : > { %v244_v33 = vadd.f32 %v243_v28, %v239_v30 }
  0x64   : > { %v249_v35 = vadd.f32 %v248_v31, %v244_v33 }
  0x66   : > { %v254_v37 = vadd.f32 %v253_v34, %v249_v35 }
  0x68   : > { %v259_v38 = vadd.f32 %v258_v36, %v254_v37 }
  0x6a   : > { %260 = vst [vmem:[%s217_s16] sm:$0xff] %v259_v38 }
  0x6b   : > { %539 = shalt.err (!%p536_p2)
}
  0x6c   : > { %s540_s8 = scalar_lea.hbm %s816_s28, 128  ;;  %s544_s4 = scalar_lea.hbm %s865_s2, 256 }
  0x6d   : > { %p541_p9 = scmp.ne.s32.totalorder %s816_s28, %s540_s8  ;;  %p545_p6 = scmp.lt.u32.totalorder %s816_s28, %s865_s2 }
  0x6e   : > { %p546_p13 = scmp.lt.u32.totalorder %s544_s4, %s540_s8  ;;  %p548_p0 = scmp.lt.u32.totalorder %s540_s8, %s816_s28 }
  0x6f   : > { %p542_p11 = pnand %p541_p9, %p878_p5 }
  0x70   : > { %p547_p8 = por %p546_p13, %p545_p6 }
  0x71   : > { %p543_p3 = pneg %p542_p11 }
  0x72   : > { %p549_p7 = por %p548_p0, %p547_p8 }
  0x74   : > { %p550_p4 = pnand %p549_p7, %p543_p3 }
  0x76   : > { %553 = shalt.err (!%p550_p4)
}
  0x77   : > { %403 = dma.vmem_to_hbm [thread:$0]  (%p878_p5), %s811_s19, 128, %s816_s28, %s262_s29  }
  0x78 PF: > { %s287_s7 = sand.u32 1, %s592_s9   ;;  %p879_p10 = scmp.ne.s32.totalorder %s871_s24, 0 }
  0x79   : > { %p880_p12 = scmp.ge.s32.totalorder %s612_s14, 2  ;;  %s288_s21 = scalar_lea.sflag [#allocation4], %s287_s7 }
  0x7b   : > { %p413_p1 = pnand %p880_p12, %p879_p10 }
  0x7d   : > { %587 = dma.done.wait (!%p413_p1), %s288_s21, 128  }
  0x7e   : > { %589 = vsyncadd (!%p413_p1), %s288_s21, 4294967168  ;;  %s21_s14 = sadd.s32 1, %s612_s14   ;;  %s881_s9 = smov %s596_s10 }
  0x7f   : > { %p18_p2 = scmp.ge.s32.totalorder %s21_s14, 4   ;;  %s882_s10 = smov %s600_s11 }
  0x80   : > { %s883_s11 = smov %s688_s23  ;;  %s884_s12 = smov %s608_s13 }
  0x81   : > { %s885_s13 = smov %s887_s17  ;;  %20 = sbr.rel (!%p18_p2) target bundleno = 8 (0x8), region = 86 }
  0x88   :  { %293 = vsyncpa [#allocation3], 1 }
  0x89   :  { %295 = vsyncpa [#allocation3 + $0x1], 1 }
  0x8a   :  { %296 = vsyncpa [#allocation6], 1 }
  0x8b   :  { %298 = vsyncpa [#allocation6 + $0x1], 1 }
  0x8c   :  { %299 = vsyncpa [#allocation4], 1 }
  0x8d   :  { %301 = vsyncpa [#allocation4 + $0x1], 1 }

</bundles_post_ra>
